<compile_context>
chip_gen: v7x
topology: tpu7x:2x2x1
jax: 0.10.0
libtpu: 0.0.40
codegen_flags: <defaults>
</compile_context>

<pallas_src>
import functools
import math

import numpy as np
import jax
import jax.numpy as jnp
from jax.experimental import pallas as pl
from jax.experimental.pallas import tpu as pltpu


# -----------------------------------------------------------------------------
# Pallas kernel: one (batch-half, lane-tile) grid step
# -----------------------------------------------------------------------------
def _robust_deconv_kernel(ur_ref, halo_ref, w_ref, b_ref, out_ref, *,
                          k, wpad, tl, cout):
    # ur_ref   : (1, 2*Cin, TL)        lane tile `lt` of flattened padded [u;r]
    # halo_ref : (1, 2*Cin, HALO)      first HALO lanes of tile `lt + 1`
    # w_ref    : (2*Cout, k*k*2*Cin)   packed [[W,|W|],[W,-|W|]], cols = (ki,kj,2Cin)
    # b_ref    : (2*Cout, 1)           packed bias
    # out_ref  : (2, 1, Cout, TL)      slab 0 -> p half, slab 1 -> n half
    win = jnp.concatenate([ur_ref[0], halo_ref[0]], axis=-1)      # (2Cin, TL+HALO)
    taps = []
    for ki in range(k):
        for kj in range(k):
            shift = ki * wpad + kj                                # static per tap
            taps.append(win[:, shift:shift + tl])                 # (2Cin, TL)
    stacked = jnp.concatenate(taps, axis=0)                       # (k*k*2Cin, TL)
    acc = jnp.dot(w_ref[...], stacked,
                  preferred_element_type=jnp.float32)             # (2Cout, TL)
    res = acc + b_ref[...]
    out_ref[0, 0] = res[:cout].astype(out_ref.dtype)
    out_ref[1, 0] = res[cout:].astype(out_ref.dtype)


# -----------------------------------------------------------------------------
# Host wrapper
# -----------------------------------------------------------------------------
@functools.partial(jax.jit,
                   static_argnames=("lane_tile", "compute_dtype", "out_dtype"))
def robust_conv_transpose2d(x, weight, bias, *, lane_tile=1024,
                            compute_dtype=jnp.bfloat16,
                            out_dtype=jnp.float32):
    """Robust (IBP) ConvTranspose2d forward.  x: (N, Cin, H, W), N even."""
    # TODO(synk): stride>1 / padding>0 / output_padding / dilation>1 / groups>1,
    # the non_negative=True path and the unrobust (r=False) branch are not
    # implemented in this kernel.
    N, cin, H, W = x.shape
    cin_w, cout, k, k2 = weight.shape
    assert cin_w == cin and k == k2 and N % 2 == 0
    nh = N // 2
    hout, wout = H + k - 1, W + k - 1
    hpad, wpad = H + 2 * (k - 1), W + 2 * (k - 1)
    l_out = hout * wpad                         # flat extent the kernel produces

    # Halo = max tap shift rounded to a power-of-two multiple of 128 lanes so
    # it always divides the (power-of-two-multiple-of-128) lane tile.
    max_shift = (k - 1) * (wpad + 1)
    halo = 128 * pl.next_power_of_2(pl.cdiv(max_shift, 128))
    # TODO(synk): very wide images (max_shift > lane_tile) need row-block tiling.
    tl = pl.cdiv(max(lane_tile, halo), halo) * halo
    if nh * pl.cdiv(l_out, tl) < 2:
        # Give the grid >= 2 steps so both v7x TensorCores get work.
        tl = max(halo, pl.cdiv(pl.cdiv(l_out, 2), halo) * halo)
    n_lt = pl.cdiv(l_out, tl)
    l_in = n_lt * tl + halo                     # lanes every block may touch

    if bias is None:
        bias = jnp.zeros((cout,), jnp.float32)

    # ---- pack u/r along channels; ONE combined pad: spatial halo plus enough
    # extra zero rows at the bottom that the flattened length covers l_in ----
    x_p, x_n = x[:nh], x[nh:]
    u = (x_p + x_n) * 0.5
    r = (x_p - x_n) * 0.5
    ur = jnp.concatenate([u, r], axis=1)                          # (nh, 2Cin, H, W)
    hp_tot = max(hpad, pl.cdiv(l_in, wpad))
    ur = jnp.pad(ur, ((0, 0), (0, 0),
                      (k - 1, hp_tot - H - (k - 1)),
                      (k - 1, k - 1)))
    ur = ur.reshape(nh, 2 * cin, hp_tot * wpad).astype(compute_dtype)
    # NOTE: output lanes with column >= wout "wrap" into the next padded row;
    # they read only zero padding and are cropped below.  Correct for
    # stride=1 / padding=0 only.

    # ---- packed weight: one matmul yields both output halves ---------------
    # correlation form: Wt[co, ci, ki, kj] = W[ci, co, k-1-ki, k-1-kj]
    wt = jnp.transpose(weight[:, :, ::-1, ::-1], (1, 0, 2, 3))    # (Cout,Cin,k,k)
    wabs = jnp.abs(wt)
    w2 = jnp.concatenate(
        [jnp.concatenate([wt, wabs], axis=1),                     # p: u*W + r*|W|
         jnp.concatenate([wt, -wabs], axis=1)], axis=0)           # n: u*W - r*|W|
    # columns ordered (ki, kj, 2Cin) to match the in-kernel tap stacking
    w2 = jnp.transpose(w2, (0, 2, 3, 1)).reshape(2 * cout, k * k * 2 * cin)
    w2 = w2.astype(compute_dtype)
    b2 = jnp.concatenate([bias, bias]).reshape(2 * cout, 1).astype(jnp.float32)

    ratio = tl // halo
    kern = functools.partial(_robust_deconv_kernel,
                             k=k, wpad=wpad, tl=tl, cout=cout)
    out_flat = pl.pallas_call(
        kern,
        out_shape=jax.ShapeDtypeStruct((2, nh, cout, n_lt * tl), out_dtype),
        grid_spec=pltpu.PrefetchScalarGridSpec(
            num_scalar_prefetch=0,
            grid=(nh, n_lt),
            in_specs=[
                pl.BlockSpec((1, 2 * cin, tl), lambda b, lt: (b, 0, lt)),
                pl.BlockSpec((1, 2 * cin, halo),
                             lambda b, lt: (b, 0, (lt + 1) * ratio)),
                pl.BlockSpec((2 * cout, k * k * 2 * cin), lambda b, lt: (0, 0)),
                pl.BlockSpec((2 * cout, 1), lambda b, lt: (0, 0)),
            ],
            out_specs=pl.BlockSpec((2, 1, cout, tl), lambda b, lt: (0, b, 0, lt)),
        ),
        compiler_params=pltpu.CompilerParams(
            dimension_semantics=("parallel", "parallel")),
    )(ur, ur, w2, b2)

    # Crop the flat lane axis back to (Hout, Wout); the p/n halves are already
    # separate leading slabs, so the final batch concat is a free reshape.
    out = out_flat[:, :, :, :l_out].reshape(2, nh, cout, hout, wpad)[..., :wout]
    return out.reshape(2 * nh, cout, hout, wout)


# -----------------------------------------------------------------------------
# Pure-numpy reference (direct scatter form of conv_transpose2d)
# -----------------------------------------------------------------------------
def _ref_conv_transpose(x, w, b):
    N, cin, H, W = x.shape
    _, cout, k, _ = w.shape
    hout, wout = H + k - 1, W + k - 1
    out = np.zeros((N, cout, hout, wout), np.float32)
    for n in range(N):
        for ci in range(cin):
            for i in range(H):
                for j in range(W):
                    out[n, :, i:i + k, j:j + k] += x[n, ci, i, j] * w[ci]
    if b is not None:
        out += b[None, :, None, None]
    return out


def _ref_forward(x, w, b, compute_dtype):
    x = np.asarray(x, np.float32)
    w = np.asarray(w, np.float32)
    b = np.asarray(b, np.float32)
    nh = x.shape[0] // 2
    p, n = x[:nh], x[nh:]
    u = (p + n) * np.float32(0.5)
    r = (p - n) * np.float32(0.5)

    # Quantize the matmul operands exactly as the kernel does (bf16 by default,
    # f32 accumulation) so the comparison is apples-to-apples.
    def q(a):
        return np.asarray(
            jnp.asarray(a, jnp.float32).astype(compute_dtype).astype(jnp.float32))

    uq, rq, wq = q(u), q(r), q(w)
    out_u = _ref_conv_transpose(uq, wq, b)
    out_r = _ref_conv_transpose(rq, np.abs(wq), None)
    return np.concatenate([out_u + out_r, out_u - out_r], axis=0)


if __name__ == "__main__":
    # Module config: in_channels=4, out_channels=8, kernel_size=3, stride=1,
    # padding=0, groups=1, dilation=1, bias=True, non_negative=False.
    in_channels, out_channels, kernel_size = 4, 8, 3
    batch, H, W = 2, 16, 16        # batch must be even (robust p/n split)

    key = jax.random.PRNGKey(0)
    kx, kw, kb = jax.random.split(key, 3)
    x = jax.random.normal(kx, (batch, in_channels, H, W), dtype=jnp.float32)
    scale = 1.0 / math.sqrt(kernel_size * kernel_size * in_channels)
    weight = jax.random.normal(
        kw, (in_channels, out_channels, kernel_size, kernel_size),
        dtype=jnp.float32) * scale
    bias = jax.random.normal(kb, (out_channels,), dtype=jnp.float32) * 0.1

    out = robust_conv_transpose2d(x, weight, bias)
    out = jax.block_until_ready(out)

    ref = _ref_forward(np.asarray(x), np.asarray(weight), np.asarray(bias),
                       jnp.bfloat16)
    np.testing.assert_allclose(np.asarray(out), ref, rtol=2e-3, atol=2e-3)

    print("KERNEL_OK")
</pallas_src>

<mosaic_0001>
module attributes {stable_mosaic.version = 11 : i64} {
  func.func @_robust_deconv_kernel(%arg0: i32, %arg1: i32, %arg2: memref<1x8x256xbf16, #tpu.memory_space<vmem>>, %arg3: memref<1x8x128xbf16, #tpu.memory_space<vmem>>, %arg4: memref<16x72xbf16, #tpu.memory_space<vmem>>, %arg5: memref<16x1xf32, #tpu.memory_space<vmem>>, %arg6: memref<2x1x8x256xf32, #tpu.memory_space<vmem>>) attributes {dimension_semantics = [#tpu.dimension_semantics<parallel>, #tpu.dimension_semantics<parallel>], iteration_bounds = array<i64: 1, 2>, scalar_prefetch = 0 : i64, scratch_operands = 0 : i64, tpu.core_type = #tpu.core_type<tc>, window_params = [{transform_indices = @transform_0, window_bounds = array<i64: 1, 8, 256>}, {transform_indices = @transform_1, window_bounds = array<i64: 1, 8, 128>}, {pipeline_mode = #tpu.pipeline_mode<synchronous>, transform_indices = @transform_2, window_bounds = array<i64: 16, 72>}, {pipeline_mode = #tpu.pipeline_mode<synchronous>, transform_indices = @transform_3, window_bounds = array<i64: 16, 1>}, {transform_indices = @transform_4, window_bounds = array<i64: 2, 1, 8, 256>}]} {
    %c0 = arith.constant 0 : index
    %c0_0 = arith.constant 0 : index
    %c0_1 = arith.constant 0 : index
    %0 = vector.load %arg2[%c0, %c0_0, %c0_1] : memref<1x8x256xbf16, #tpu.memory_space<vmem>>, vector<1x8x256xbf16>
    %1 = vector.shape_cast %0 : vector<1x8x256xbf16> to vector<8x256xbf16>
    %c0_2 = arith.constant 0 : index
    %c0_3 = arith.constant 0 : index
    %c0_4 = arith.constant 0 : index
    %2 = vector.load %arg3[%c0_2, %c0_3, %c0_4] : memref<1x8x128xbf16, #tpu.memory_space<vmem>>, vector<1x8x128xbf16>
    %3 = vector.shape_cast %2 : vector<1x8x128xbf16> to vector<8x128xbf16>
    %4 = tpu.concatenate %1, %3 in 1 : vector<8x256xbf16>, vector<8x128xbf16> -> vector<8x384xbf16>
    %5 = vector.extract_strided_slice %4 {offsets = [0, 0], sizes = [8, 256], strides = [1, 1]} : vector<8x384xbf16> to vector<8x256xbf16>
    %6 = vector.extract_strided_slice %4 {offsets = [0, 1], sizes = [8, 256], strides = [1, 1]} : vector<8x384xbf16> to vector<8x256xbf16>
    %7 = vector.extract_strided_slice %4 {offsets = [0, 2], sizes = [8, 256], strides = [1, 1]} : vector<8x384xbf16> to vector<8x256xbf16>
    %8 = vector.extract_strided_slice %4 {offsets = [0, 20], sizes = [8, 256], strides = [1, 1]} : vector<8x384xbf16> to vector<8x256xbf16>
    %9 = vector.extract_strided_slice %4 {offsets = [0, 21], sizes = [8, 256], strides = [1, 1]} : vector<8x384xbf16> to vector<8x256xbf16>
    %10 = vector.extract_strided_slice %4 {offsets = [0, 22], sizes = [8, 256], strides = [1, 1]} : vector<8x384xbf16> to vector<8x256xbf16>
    %11 = vector.extract_strided_slice %4 {offsets = [0, 40], sizes = [8, 256], strides = [1, 1]} : vector<8x384xbf16> to vector<8x256xbf16>
    %12 = vector.extract_strided_slice %4 {offsets = [0, 41], sizes = [8, 256], strides = [1, 1]} : vector<8x384xbf16> to vector<8x256xbf16>
    %13 = vector.extract_strided_slice %4 {offsets = [0, 42], sizes = [8, 256], strides = [1, 1]} : vector<8x384xbf16> to vector<8x256xbf16>
    %14 = tpu.concatenate %5, %6, %7, %8, %9, %10, %11, %12, %13 in 0 : vector<8x256xbf16>, vector<8x256xbf16>, vector<8x256xbf16>, vector<8x256xbf16>, vector<8x256xbf16>, vector<8x256xbf16>, vector<8x256xbf16>, vector<8x256xbf16>, vector<8x256xbf16> -> vector<72x256xbf16>
    %c0_5 = arith.constant 0 : index
    %c0_6 = arith.constant 0 : index
    %15 = vector.load %arg4[%c0_5, %c0_6] : memref<16x72xbf16, #tpu.memory_space<vmem>>, vector<16x72xbf16>
    %cst = arith.constant dense<0.000000e+00> : vector<16x256xf32>
    %16 = tpu.matmul %15, %14, %cst {dimension_numbers = #tpu.dot_dimension_numbers<[1], [0], [0], [1], [0, 0, 1, 1], [], []>} : vector<16x72xbf16>, vector<72x256xbf16>, vector<16x256xf32> -> vector<16x256xf32>
    %c0_7 = arith.constant 0 : index
    %c0_8 = arith.constant 0 : index
    %17 = vector.load %arg5[%c0_7, %c0_8] : memref<16x1xf32, #tpu.memory_space<vmem>>, vector<16x1xf32>
    %18 = vector.broadcast %17 : vector<16x1xf32> to vector<16x256xf32>
    %19 = arith.addf %16, %18 : vector<16x256xf32>
    %20 = vector.extract_strided_slice %19 {offsets = [0, 0], sizes = [8, 256], strides = [1, 1]} : vector<16x256xf32> to vector<8x256xf32>
    %c0_9 = arith.constant 0 : index
    %c0_10 = arith.constant 0 : index
    %c0_11 = arith.constant 0 : index
    %c0_12 = arith.constant 0 : index
    %21 = vector.load %arg6[%c0_9, %c0_10, %c0_11, %c0_12] : memref<2x1x8x256xf32, #tpu.memory_space<vmem>>, vector<1x1x8x256xf32>
    %22 = vector.shape_cast %21 : vector<1x1x8x256xf32> to vector<8x256xf32>
    %23 = vector.shape_cast %20 : vector<8x256xf32> to vector<1x1x8x256xf32>
    tpu.vector_store %arg6[%c0_9, %c0_10, %c0_11, %c0_12], %23 {strides = array<i32>} : memref<2x1x8x256xf32, #tpu.memory_space<vmem>>, vector<1x1x8x256xf32>,
    %24 = vector.extract_strided_slice %19 {offsets = [8, 0], sizes = [8, 256], strides = [1, 1]} : vector<16x256xf32> to vector<8x256xf32>
    %c1 = arith.constant 1 : index
    %c0_13 = arith.constant 0 : index
    %c0_14 = arith.constant 0 : index
    %c0_15 = arith.constant 0 : index
    %25 = vector.load %arg6[%c1, %c0_13, %c0_14, %c0_15] : memref<2x1x8x256xf32, #tpu.memory_space<vmem>>, vector<1x1x8x256xf32>
    %26 = vector.shape_cast %25 : vector<1x1x8x256xf32> to vector<8x256xf32>
    %27 = vector.shape_cast %24 : vector<8x256xf32> to vector<1x1x8x256xf32>
    tpu.vector_store %arg6[%c1, %c0_13, %c0_14, %c0_15], %27 {strides = array<i32>} : memref<2x1x8x256xf32, #tpu.memory_space<vmem>>, vector<1x1x8x256xf32>,
    return
  }
  func.func @transform_0(%arg0: i32, %arg1: i32) -> (i32, i32, i32) {
    %c0_i32 = arith.constant 0 : i32
    %c0_i32_0 = arith.constant 0 : i32
    return %arg0, %c0_i32, %arg1 : i32, i32, i32
  }
  func.func @transform_1(%arg0: i32, %arg1: i32) -> (i32, i32, i32) {
    %c1_i32 = arith.constant 1 : i32
    %0 = arith.addi %arg1, %c1_i32 : i32
    %c2_i32 = arith.constant 2 : i32
    %1 = arith.muli %0, %c2_i32 : i32
    %c0_i32 = arith.constant 0 : i32
    %c0_i32_0 = arith.constant 0 : i32
    return %arg0, %c0_i32, %1 : i32, i32, i32
  }
  func.func @transform_2(%arg0: i32, %arg1: i32) -> (i32, i32) {
    %c0_i32 = arith.constant 0 : i32
    %c0_i32_0 = arith.constant 0 : i32
    %c0_i32_1 = arith.constant 0 : i32
    return %c0_i32, %c0_i32_0 : i32, i32
  }
  func.func @transform_3(%arg0: i32, %arg1: i32) -> (i32, i32) {
    %c0_i32 = arith.constant 0 : i32
    %c0_i32_0 = arith.constant 0 : i32
    %c0_i32_1 = arith.constant 0 : i32
    return %c0_i32, %c0_i32_0 : i32, i32
  }
  func.func @transform_4(%arg0: i32, %arg1: i32) -> (i32, i32, i32, i32) {
    %c0_i32 = arith.constant 0 : i32
    %c0_i32_0 = arith.constant 0 : i32
    %c0_i32_1 = arith.constant 0 : i32
    return %c0_i32, %arg0, %c0_i32_0, %arg1 : i32, i32, i32, i32
  }
}

</mosaic_0001>

<bundles_post_ra>
// kernel: robust_conv_transpose2d.1
= control target key start
LH: loop header
LB: loop body
LE: loop exit
PB: predicated region body
PF: predicated region fallthrough
CT: control target
= control target key end

     0   :  { %s762_s15 = smov 0   ;;  %s764_s16 = smov 0   ;;  %s853_s0 = inlined_call_operand.vmem [shape: bf16[1,8,640], index: 0, kind: input, shape index: {}, may-alias: {0,1}]   ;;  %s854_s1 = inlined_call_operand.vmem [shape: bf16[1,8,640], index: 1, kind: input, shape index: {}, may-alias: {0,1}]   ;;  %s855_s2 = inlined_call_operand.vmem [shape: bf16[16,72], index: 2, kind: input, shape index: {}]   ;;  %s856_s3 = inlined_call_operand.vmem [shape: f32[16,1], index: 3, kind: input, shape index: {}]   ;;  %s857_s4 = inlined_call_operand.vmem [shape: f32[2,1,8,512], index: 4, kind: output, shape index: {}]  }
   0x1   :  { %s766_s17 = smov 0   ;;  %s768_s18 = smov 0  }
   0x2   :  { %s770_s19 = smov 0  }
   0x3 LB: > { %s603_s20 = sadd.s32 4294967295, %s726_s19   ;;  %s23_s21 = sadd.s32 1, %s722_s18  ;;  %s726_s19 = sphi %s770_s19, %s14_s19   ;;  %s722_s18 = sphi %s768_s18, %s862_s18   ;;  %s718_s17 = sphi %s766_s17, %s861_s17   ;;  %s714_s16 = sphi %s764_s16, %s860_s16   ;;  %s710_s15 = sphi %s762_s15, %s859_s15  }
   0x4   : > { %p24_p0 = scmp.ge.s32.totalorder %s23_s21, 2  ;;  %s137_s22 = sadd.s32 1, %s714_s16 }
   0x5   : > { %p147_p1 = scmp.ne.s32.totalorder %s714_s16, %s710_s15  ;;  %p148_p2 = scmp.eq.s32.totalorder %s603_s20, 1 }
   0x6   : > { %s864_s21 = smov (%p24_p0, %s23_s21), 0  ;;  %p609_p4 = scmp.ge.s32.totalorder %s726_s19, 1 }
   0x7   : > { %p794_p3 = por %p148_p2, %p147_p1  ;;  %s133_s24 = ssub.s32 %s722_s18, %s864_s21 }
   0x8   : > { %p214_p5 = scmp.lt.s32.totalorder %s726_s19, 3  ;;  %p135_p6 = scmp.eq.s32.totalorder %s133_s24, 0 }
   0xa   : > { %p215_p7 = pnand %p609_p4, %p214_p5 }
   0xb   : > { %s803_s25 = scalar_select %p135_p6, %s714_s16, %s137_s22  }
   0xc   : > { %218 = sbr.rel (%p215_p7) target bundleno = 415 (0x19f), region = 36  ;;  %s611_s26 = sshll.u32 (!%p215_p7), %s718_s17, 1  ;;  %v735_v5 = vmov (!%p215_p7), 0   ;;  %v407_v6 = vld [vmem:[%s856_s3] sm:$0xff] (!%p215_p7)  ;;  %v408_v7 = vld [vmem:[%s856_s3 + $0x8] sm:$0xff] (!%p215_p7)  ;;  %vm306_vm0 = vcmask (!%p215_p7), 1039360  }
   0xd   : > { %s632_s27 = sadd.s32 (!%p215_p7), 2, %s611_s26  ;;  %p264_p8 = scmp.lt.s32.totalorder (!%p215_p7), %s611_s26, 4  ;;  %466 = vmatprep.mubr.bf16.mxu0 (!%p215_p7), %v735_v5  ;;  %683 = vset.pattern.permute.xlu0 (!%p215_p7), %v735_v5  ;;  %vm372_vm1 = vcmask (!%p215_p7), 1043456   ;;  %vm315_vm2 = vcmask (!%p215_p7), 1031168   ;;  %vm324_vm3 = vcmask (!%p215_p7), 883712   ;;  %vm333_vm4 = vcmask (!%p215_p7), 875520  }
   0xe   : > { %p279_p9 = scmp.lt.s32.totalorder (!%p215_p7), %s632_s27, 4  ;;  %s728_s10 = smov (!%p215_p7), 126   ;;  %684 = vset.pattern.permute.xlu1 (!%p215_p7), %v735_v5  ;;  %vm342_vm5 = vcmask (!%p215_p7), 867328   ;;  %vm351_vm6 = vcmask (!%p215_p7), 719872   ;;  %vm360_vm7 = vcmask (!%p215_p7), 711680   ;;  %vm369_vm8 = vcmask (!%p215_p7), 703488  }
   0xf   : > { %s729_s11 = smov (!%p215_p7), 127   ;;  %s730_s12 = smov (!%p215_p7), 108   ;;  %v687_v57 = vld [vmem:[%s855_s2] sm:$0xff] (!%p215_p7)   ;;  %vm424_vm9 = vcmask (!%p215_p7), 588800  }
  0x10   : > { %s731_s13 = smov (!%p215_p7), 107   ;;  %s732_s14 = smov (!%p215_p7), 106  }
  0x11   : > { %s733_s20 = smov (!%p215_p7), 88   ;;  %s734_s22 = smov (!%p215_p7), 87  }
  0x12   : > { %s736_s24 = smov (!%p215_p7), 86  }
  0x13   : > { %s866_s26 = smov (!%p264_p8, %s611_s26), 4  ;;  %s868_s27 = smov (!%p279_p9, %s632_s27), 4 }
  0x14   : > { %s612_s28 = sshll.u32 %s866_s26, 2  ;;  %s614_s29 = sshll.u32 %s868_s27, 2 }
  0x15   : > { %s269_s6 = scalar_lea.vmem %s853_s0, %s612_s28  ;;  %s284_s9 = scalar_lea.vmem %s854_s1, %s614_s29 }
  0x16   : > { %v289_v0 = vld [vmem:[%s269_s6] sm:$0xff]  ;;  %s254_s6 = sand.u32 1, %s710_s15   ;;  %s633_s15 = sshll.u32 (%p794_p3), %s718_s17, 4 }
  0x17   : > { %v290_v1 = vld [vmem:[%s284_s9] sm:$0xf]  ;;  %v615_v2 = vcombine.low %v289_v0, %v289_v0  ;;  %v616_v3 = vcombine.high %v289_v0, %v289_v0  ;;  %s610_s7 = sshll.u32 %s254_s6, 5 }
  0x18   : > { %313 = vrot.lane.b32.xlu0 %v290_v1, %s728_s10  ;;  %v299_v4 = vrot.slane %v290_v1, 4  ;;  %s256_s8 = scalar_lea.vmem [#allocation2], %s610_s7 }
  0x19   : > { %300 = vrot.lane.b32.xlu1 %v615_v2, %s729_s11 }
  0x1c   : > { %302 = vrot.lane.b32.xlu0 %v616_v3, %s729_s11 }
  0x1d   : > { %311 = vrot.lane.b32.xlu1 %v616_v3, %s728_s10 }
  0x20   : > { %304 = vrot.lane.b32.xlu0 %v299_v4, %s729_s11  ;;  %s493_s11 = scalar_lea.vmem (%p794_p3), %s857_s4, %s633_s15 }
  0x21   : > { %320 = vrot.lane.b32.xlu1 %v616_v3, %s730_s12 }
  0x24   : > { %322 = vrot.lane.b32.xlu0 %v299_v4, %s730_s12 }
  0x25   : > { %309 = vrot.lane.b32.xlu1 %v615_v2, %s728_s10 }
  0x28   : > { %318 = vrot.lane.b32.xlu0 %v615_v2, %s730_s12 }
  0x29   : > { %329 = vrot.lane.b32.xlu1 %v616_v3, %s731_s13 }
  0x2c   : > { %331 = vrot.lane.b32.xlu0 %v290_v1, %s731_s13 }
  0x2d   : > { %338 = vrot.lane.b32.xlu1 %v616_v3, %s732_s14 }
  0x30   : > { %340 = vrot.lane.b32.xlu0 %v299_v4, %s732_s14 }
  0x31   : > { %327 = vrot.lane.b32.xlu1 %v615_v2, %s731_s13 }
  0x34   : > { %336 = vrot.lane.b32.xlu0 %v615_v2, %s732_s14 }
  0x35   : > { %347 = vrot.lane.b32.xlu1 %v616_v3, %s733_s20 }
  0x38   : > { %349 = vrot.lane.b32.xlu0 %v290_v1, %s733_s20 }
  0x39   : > { %356 = vrot.lane.b32.xlu1 %v616_v3, %s734_s22 }
  0x3c   : > { %358 = vrot.lane.b32.xlu0 %v299_v4, %s734_s22 }
  0x3d   : > { %345 = vrot.lane.b32.xlu1 %v615_v2, %s733_s20 }
  0x40   : > { %354 = vrot.lane.b32.xlu0 %v615_v2, %s734_s22 }
  0x41   : > { %363 = vrot.lane.b32.xlu1 %v615_v2, %s736_s24 }
  0x44   : > { %365 = vrot.lane.b32.xlu0 %v616_v3, %s736_s24 }
  0x45   : > { %367 = vrot.lane.b32.xlu1 %v290_v1, %s736_s24 }
  0x48   : > { %411 = vperm.xlu0 %683, %v407_v6  }
  0x49   : > { %416 = vperm.xlu1 %684, %v408_v7  }
  0x8a   : > { %v314_v8 = vpop.permute.xlu0 %313 }
  0x8b   : > { %v301_v9 = vpop.permute.xlu1 %300 }
  0x8e   : > { %v303_v10 = vpop.permute.xlu0 %302 }
  0x8f   : > { %v312_v11 = vpop.permute.xlu1 %311  ;;  %v307_v12 = vsel %vm306_vm0, %v301_v9, %v303_v10 }
  0x90   : > { %v375_v17 = vsel %vm372_vm1, %v615_v2, %v307_v12  ;;  %v317_v19 = vsel %vm315_vm2, %v312_v11, %v314_v8 }
  0x92   : > { %v305_v13 = vpop.permute.xlu0 %304 }
  0x93   : > { %v308_v14 = vsel %vm306_vm0, %v303_v10, %v305_v13  ;;  %v321_v15 = vpop.permute.xlu1 %320 }
  0x94   : > { %v379_v16 = vsel %vm372_vm1, %v616_v3, %v308_v14 }
  0x95   : > { %434 = vmatprep.subr.bf16.mxu0 %v379_v16 }
  0x96   : > { %v323_v18 = vpop.permute.xlu0 %322  ;;  %435 = vmatpush1.bf16.msra.mxu0 %v375_v17 }
  0x97   : > { %v326_v20 = vsel %vm324_vm3, %v321_v15, %v323_v18  ;;  %v310_v21 = vpop.permute.xlu1 %309 }
  0x98   : > { %v387_v22 = vsel %vm372_vm1, %v317_v19, %v326_v20  ;;  %v316_v24 = vsel %vm315_vm2, %v310_v21, %v312_v11 }
  0x99   : > { %436 = vmatprep.subr.bf16.mxu0 %v387_v22 }
  0x9a   : > { %v319_v23 = vpop.permute.xlu0 %318 }
  0x9b   : > { %v325_v25 = vsel %vm324_vm3, %v319_v23, %v321_v15  ;;  %v330_v26 = vpop.permute.xlu1 %329 }
  0x9c   : > { %v383_v27 = vsel %vm372_vm1, %v316_v24, %v325_v25 }
  0x9d   : > { %437 = vmatpush1.bf16.msra.mxu0 %v383_v27 }
  0x9e   : > { %v332_v28 = vpop.permute.xlu0 %331 }
  0x9f   : > { %v339_v29 = vpop.permute.xlu1 %338  ;;  %v335_v31 = vsel %vm333_vm4, %v330_v26, %v332_v28 }
  0xa2   : > { %v341_v30 = vpop.permute.xlu0 %340 }
  0xa3   : > { %v344_v32 = vsel %vm342_vm5, %v339_v29, %v341_v30  ;;  %v328_v33 = vpop.permute.xlu1 %327 }
  0xa4   : > { %v395_v34 = vsel %vm372_vm1, %v335_v31, %v344_v32  ;;  %v334_v36 = vsel %vm333_vm4, %v328_v33, %v330_v26 }
  0xa5   : > { %438 = vmatprep.subr.bf16.mxu0 %v395_v34 }
  0xa6   : > { %v337_v35 = vpop.permute.xlu0 %336 }
  0xa7   : > { %v343_v37 = vsel %vm342_vm5, %v337_v35, %v339_v29  ;;  %v348_v38 = vpop.permute.xlu1 %347 }
  0xa8   : > { %v391_v39 = vsel %vm372_vm1, %v334_v36, %v343_v37 }
  0xa9   : > { %439 = vmatpush1.bf16.msra.mxu0 %v391_v39 }
  0xaa   : > { %v350_v40 = vpop.permute.xlu0 %349 }
  0xab   : > { %v357_v41 = vpop.permute.xlu1 %356  ;;  %v353_v43 = vsel %vm351_vm6, %v348_v38, %v350_v40 }
  0xae   : > { %v359_v42 = vpop.permute.xlu0 %358 }
  0xaf   : > { %v362_v44 = vsel %vm360_vm7, %v357_v41, %v359_v42  ;;  %v346_v45 = vpop.permute.xlu1 %345 }
  0xb0   : > { %v403_v46 = vsel %vm372_vm1, %v353_v43, %v362_v44  ;;  %v352_v48 = vsel %vm351_vm6, %v346_v45, %v348_v38 }
  0xb1   : > { %440 = vmatprep.subr.bf16.mxu0 %v403_v46 }
  0xb2   : > { %v355_v47 = vpop.permute.xlu0 %354 }
  0xb3   : > { %v361_v49 = vsel %vm360_vm7, %v355_v47, %v357_v41  ;;  %v364_v50 = vpop.permute.xlu1 %363 }
  0xb4   : > { %v399_v51 = vsel %vm372_vm1, %v352_v48, %v361_v49 }
  0xb5   : > { %441 = vmatpush1.bf16.msra.mxu0 %v399_v51 }
  0xb6   : > { %v366_v52 = vpop.permute.xlu0 %365 }
  0xb7   : > { %v370_v53 = vsel %vm369_vm8, %v364_v50, %v366_v52  ;;  %v368_v54 = vpop.permute.xlu1 %367 }
  0xb8   : > { %v371_v55 = vsel %vm369_vm8, %v366_v52, %v368_v54  ;;  %v429_v56 = vsel %vm372_vm1, %v370_v53, 0 }
  0xb9   : > { %618 = vmatprep.subr.msk.bf16.mxu0 %vm372_vm1, %v371_v55 }
  0xba   : > { %443 = vmatpush1.bf16.msra.mxu0 %v429_v56 }
  0xbd   : > { %619 = vmatmul.mubr.msk.bf16.vlgmr.msra.gmra.mrb[0].mxu0 %vm424_vm9, %v687_v57 }
  0xc7   : > { %v412_v58 = vpop.permute.xlu0 %411 }
  0xc8   : > { %v417_v60 = vpop.permute.xlu1 %416 }
 0x190   : > { %v468_v59 = vpop.f32.mrb[0].mxu0  ;;  %488 = sbr.rel (!%p794_p3) target bundleno = 415 (0x19f), region = 40 }
 0x191   : > { %v469_v61 = vadd.f32 %v468_v59, %v412_v58  ;;  %v470_v62 = vpop.f32.mrb[1].mxu0 }
 0x192   : > { %v471_v63 = vadd.f32 %v470_v62, %v412_v58  ;;  %v472_v0 = vpop.f32.mrb[2].mxu0 }
 0x193   : > { %477 = vst [vmem:[%s256_s8] sm:$0xff] %v469_v61  ;;  %v473_v1 = vadd.f32 %v472_v0, %v417_v60  ;;  %v474_v2 = vpop.f32.mrb[3].mxu0 }
 0x194   : > { %478 = vst [vmem:[%s256_s8 + $0x8] sm:$0xff] %v471_v63  ;;  %v475_v3 = vadd.f32 %v474_v2, %v417_v60 }
 0x195   : > { %620 = vst [vmem:[%s256_s8 + $0x10] sm:$0xff] %v473_v1 }
 0x196   : > { %621 = vst [vmem:[%s256_s8 + $0x18] sm:$0xff] %v475_v3 }
 0x19a   : > { %v506_v4 = vld [vmem:[%s256_s8] sm:$0xff] }
 0x19b   : > { %v508_v5 = vld [vmem:[%s256_s8 + $0x8] sm:$0xff]  ;;  %507 = vst [vmem:[%s493_s11] sm:$0xff] %v506_v4 }
 0x19c   : > { %v510_v6 = vld [vmem:[%s256_s8 + $0x10] sm:$0xff]  ;;  %509 = vst [vmem:[%s493_s11 + $0x8] sm:$0xff] %v508_v5 }
 0x19d   : > { %v512_v7 = vld [vmem:[%s256_s8 + $0x18] sm:$0xff]  ;;  %511 = vst [vmem:[%s493_s11 + $0x20] sm:$0xff] %v510_v6 }
 0x19e   : > { %513 = vst [vmem:[%s493_s11 + $0x28] sm:$0xff] %v512_v7 }
 0x19f PF: > { %s14_s19 = sadd.s32 1, %s726_s19   ;;  %s859_s15 = smov %s714_s16 }
 0x1a0   : > { %p11_p10 = scmp.ge.s32.totalorder %s14_s19, 4   ;;  %s860_s16 = smov %s803_s25 }
 0x1a1   : > { %s861_s17 = smov %s722_s18  ;;  %s862_s18 = smov %s864_s21 }
 0x1a2   :  { %13 = sbr.rel (!%p11_p10) target bundleno = 3 (0x3), region = 93 }

</bundles_post_ra>
